<compile_context>
chip_gen: v6e
topology: v6e:2x2x1
jax: 0.10.0
libtpu: 0.0.40
codegen_flags: <defaults>
</compile_context>

<pallas_src>
import math

import jax
import jax.numpy as jnp
from jax.experimental import pallas as pl
from jax.experimental.pallas import tpu as pltpu


def _round_up(x, m):
    return (x + m - 1) // m * m


def _gelu_tanh(x):
    # gelu_pytorch_tanh (SigLIP hidden_act):
    #   0.5*x*(1+tanh(sqrt(2/pi)*(x+0.044715*x^3)))  -- tanh runs on the EUP.
    c = math.sqrt(2.0 / math.pi)
    return 0.5 * x * (1.0 + jnp.tanh(c * (x + 0.044715 * x * x * x)))


def _mlp_kernel(x_ref, w1_ref, b1_ref, w2_ref, b2_ref, o_ref, acc_ref):
    # Grid: (token tiles, intermediate tiles). Axis 1 is the reduction axis.
    j = pl.program_id(1)

    @pl.when(j == 0)
    def _init():
        # Fold the fc2 bias into the accumulator init (saves a VPU pass later).
        acc_ref[...] = jnp.broadcast_to(
            b2_ref[...].astype(jnp.float32), acc_ref.shape)

    # Cast activations to the MXU dtype in-kernel; the VPU cast is hidden under
    # the MXU and avoids a separate XLA cast pass + extra HBM traffic.
    x = x_ref[...].astype(w1_ref.dtype)

    # fc1 slice: (tm, H) @ (H, tn) -> f32, bias + GELU in f32.
    h = jnp.dot(x, w1_ref[...], preferred_element_type=jnp.float32)
    h = h + b1_ref[...].astype(jnp.float32)
    g = _gelu_tanh(h)

    # fc2 partial: (tm, tn) @ (tn, H), accumulate in the f32 scratch.
    acc_ref[...] += jnp.dot(g.astype(w2_ref.dtype), w2_ref[...],
                            preferred_element_type=jnp.float32)

    @pl.when(j == pl.num_programs(1) - 1)
    def _finalize():
        o_ref[...] = acc_ref[...].astype(o_ref.dtype)


def _default_vmem_limit():
    """Generation-aware VMEM budget: leave headroom below physical capacity."""
    try:
        cap = pltpu.get_tpu_info().vmem_capacity_bytes
    except Exception:
        cap = 128 * 1024 * 1024
    if cap <= 64 * 1024 * 1024:
        # v7x: 64 MiB physical per TensorCore -> leave room for compiler scratch.
        return 48 * 1024 * 1024
    # v5e / v6e: 128 MiB physical.
    return 100 * 1024 * 1024


def _choose_tn(intermediate, tn_target):
    """Lane-dense intermediate tile: minimise padding of I first, then prefer
    the largest tile <= tn_target (fewest reduction steps).  E.g. I=4304 ->
    tn=1536 (I_pad=4608, ~7% padding) instead of tn=1024 (I_pad=5120, ~19%)."""
    if intermediate <= tn_target:
        return _round_up(intermediate, 128)
    best_tn, best_pad = 128, float("inf")
    tn = 128
    while tn <= tn_target:
        pad = _round_up(intermediate, tn)
        if pad < best_pad or (pad == best_pad and tn > best_tn):
            best_pad, best_tn = pad, tn
        tn += 128
    return best_tn


def prepare_siglip2_mlp_params(w1, b1, w2, b2, *,
                               compute_dtype=jnp.bfloat16, tn=1536):
    """One-time parameter preparation (hoisted out of the per-call path):
    pad the intermediate dim to a clean tile multiple and cast the matmul
    operands to the MXU dtype.  Weights use (in_features, out_features) layout,
    i.e. pre-transposed relative to torch.nn.Linear.weight."""
    H, I = w1.shape
    tn_eff = _choose_tn(I, tn)
    I_pad = _round_up(I, tn_eff)
    if I_pad != I:
        # Zero padding is exact: gelu(0)=0 and the padded W2 rows are zero.
        w1 = jnp.pad(w1, ((0, 0), (0, I_pad - I)))
        b1 = jnp.pad(b1, ((0, I_pad - I),))
        w2 = jnp.pad(w2, ((0, I_pad - I), (0, 0)))
    return dict(
        w1=w1.astype(compute_dtype),
        b1=b1.astype(jnp.float32).reshape(1, I_pad),
        w2=w2.astype(compute_dtype),
        b2=b2.astype(jnp.float32).reshape(1, H),
        hidden_size=H,
        intermediate_size=I,
        i_pad=I_pad,
        tn=tn_eff,
    )


def siglip2_mlp(hidden_states, params, *, tm=512, vmem_limit_bytes=None):
    """hidden_states: (B, S, H); params: output of prepare_siglip2_mlp_params."""
    B, S, H = hidden_states.shape
    assert H == params["hidden_size"]
    T = B * S
    out_dtype = hidden_states.dtype

    w1, b1, w2, b2 = params["w1"], params["b1"], params["w2"], params["b2"]
    I_pad, tn_eff = params["i_pad"], params["tn"]

    if vmem_limit_bytes is None:
        vmem_limit_bytes = _default_vmem_limit()

    # Token tile: large (arithmetic intensity ~ 2*tm FLOP / weight byte), but
    # clamped for tiny inputs (>=16 rows for clean sublane packing).
    tm_eff = min(tm, _round_up(T, 16))
    # Keep >=2 token tiles on the "parallel" axis for v7x megacore when the
    # input is big enough to split.
    if pl.cdiv(T, tm_eff) < 2 and T >= 256:
        tm_eff = _round_up(pl.cdiv(T, 2), 128)

    # Simple VMEM fit check (double-buffered inputs/outputs + f32 accumulator);
    # shrink the token tile if a very large hidden size would not fit.
    def _vmem_estimate(tm_):
        x_b = 2 * tm_ * H * hidden_states.dtype.itemsize
        o_b = 2 * tm_ * H * jnp.dtype(out_dtype).itemsize
        acc_b = tm_ * H * 4
        w1_b = 2 * H * tn_eff * w1.dtype.itemsize
        w2_b = 2 * tn_eff * H * w2.dtype.itemsize
        bias_b = 2 * (tn_eff + H) * 4
        return x_b + o_b + acc_b + w1_b + w2_b + bias_b

    while _vmem_estimate(tm_eff) > vmem_limit_bytes and tm_eff > 128:
        tm_eff = max(128, _round_up(tm_eff // 2, 128))

    T_pad = _round_up(T, tm_eff)
    x = hidden_states.reshape(T, H)
    if T_pad != T:
        x = jnp.pad(x, ((0, T_pad - T), (0, 0)))

    grid = (T_pad // tm_eff, I_pad // tn_eff)

    out = pl.pallas_call(
        _mlp_kernel,
        out_shape=jax.ShapeDtypeStruct((T_pad, H), out_dtype),
        grid_spec=pltpu.PrefetchScalarGridSpec(
            num_scalar_prefetch=0,
            grid=grid,
            in_specs=[
                pl.BlockSpec((tm_eff, H), lambda i, j: (i, 0)),   # x tile (reused over j)
                pl.BlockSpec((H, tn_eff), lambda i, j: (0, j)),   # fc1 weight slice
                pl.BlockSpec((1, tn_eff), lambda i, j: (0, j)),   # fc1 bias slice
                pl.BlockSpec((tn_eff, H), lambda i, j: (j, 0)),   # fc2 weight slice
                pl.BlockSpec((1, H), lambda i, j: (0, 0)),        # fc2 bias
            ],
            out_specs=pl.BlockSpec((tm_eff, H), lambda i, j: (i, 0)),
            scratch_shapes=[pltpu.VMEM((tm_eff, H), jnp.float32)],
        ),
        compiler_params=pltpu.CompilerParams(
            dimension_semantics=("parallel", "arbitrary"),
            vmem_limit_bytes=vmem_limit_bytes,
        ),
    )(x, w1, b1, w2, b2)

    if T_pad != T:
        out = out[:T]
    return out.reshape(B, S, H)


def _reference(hidden_states, w1, b1, w2, b2):
    h = hidden_states @ w1 + b1
    h = _gelu_tanh(h)
    return h @ w2 + b2


if __name__ == "__main__":
    # Small config consistent with the module: hidden_size=32, intermediate_size=64
    batch, seq, hidden, intermediate = 2, 8, 32, 64

    key = jax.random.PRNGKey(0)
    kx, kw1, kb1, kw2, kb2 = jax.random.split(key, 5)

    x = jax.random.normal(kx, (batch, seq, hidden), dtype=jnp.float32)
    # PyTorch nn.Linear stores weight as (out, in); we keep them pre-transposed
    # as (in, out) so the kernel does x @ W + b.
    w1 = jax.random.normal(kw1, (hidden, intermediate), dtype=jnp.float32) * 0.05
    b1 = jax.random.normal(kb1, (intermediate,), dtype=jnp.float32) * 0.01
    w2 = jax.random.normal(kw2, (intermediate, hidden), dtype=jnp.float32) * 0.05
    b2 = jax.random.normal(kb2, (hidden,), dtype=jnp.float32) * 0.01

    # One-time weight prep (pad + bf16 cast) — hoisted out of the forward path.
    params = prepare_siglip2_mlp_params(w1, b1, w2, b2)
    params = jax.tree_util.tree_map(
        lambda v: jax.block_until_ready(v) if isinstance(v, jax.Array) else v,
        params)

    out = siglip2_mlp(x, params)
    out = jax.block_until_ready(out)

    ref = _reference(x, w1, b1, w2, b2)
    assert out.shape == (batch, seq, hidden)
    # bf16 matmul operands with f32 accumulation -> loosened tolerance.
    assert jnp.allclose(out, ref, atol=2e-2, rtol=2e-2), "mismatch vs reference"

    print("KERNEL_OK")
</pallas_src>

<mosaic_0001>
module attributes {stable_mosaic.version = 11 : i64} {
  func.func @_mlp_kernel(%arg0: i32, %arg1: i32, %arg2: memref<16x32xf32, #tpu.memory_space<vmem>>, %arg3: memref<32x128xbf16, #tpu.memory_space<vmem>>, %arg4: memref<1x128xf32, #tpu.memory_space<vmem>>, %arg5: memref<128x32xbf16, #tpu.memory_space<vmem>>, %arg6: memref<1x32xf32, #tpu.memory_space<vmem>>, %arg7: memref<16x32xf32, #tpu.memory_space<vmem>>, %arg8: memref<16x32xf32, #tpu.memory_space<vmem>>) attributes {dimension_semantics = [#tpu.dimension_semantics<parallel>, #tpu.dimension_semantics<arbitrary>], iteration_bounds = array<i64: 1, 1>, scalar_prefetch = 0 : i64, scratch_operands = 1 : i64, tpu.core_type = #tpu.core_type<tc>, window_params = [{transform_indices = @transform_0, window_bounds = array<i64: 16, 32>}, {transform_indices = @transform_1, window_bounds = array<i64: 32, 128>}, {transform_indices = @transform_2, window_bounds = array<i64: 1, 128>}, {transform_indices = @transform_3, window_bounds = array<i64: 128, 32>}, {pipeline_mode = #tpu.pipeline_mode<synchronous>, transform_indices = @transform_4, window_bounds = array<i64: 1, 32>}, {transform_indices = @transform_5, window_bounds = array<i64: 16, 32>}]} {
    %c0_i32 = arith.constant 0 : i32
    %0 = arith.cmpi eq, %arg1, %c0_i32 : i32
    %1 = arith.extui %0 : i1 to i32
    %c0_i32_0 = arith.constant 0 : i32
    %2 = arith.cmpi ne, %1, %c0_i32_0 : i32
    scf.if %2 {
      %c0_19 = arith.constant 0 : index
      %c0_20 = arith.constant 0 : index
      %32 = vector.load %arg6[%c0_19, %c0_20] : memref<1x32xf32, #tpu.memory_space<vmem>>, vector<1x32xf32>
      %33 = vector.shape_cast %32 : vector<1x32xf32> to vector<1x32xf32>
      %34 = vector.broadcast %33 : vector<1x32xf32> to vector<16x32xf32>
      %c0_21 = arith.constant 0 : index
      %c0_22 = arith.constant 0 : index
      %35 = vector.load %arg8[%c0_21, %c0_22] : memref<16x32xf32, #tpu.memory_space<vmem>>, vector<16x32xf32>
      tpu.vector_store %arg8[%c0_21, %c0_22], %34 {strides = array<i32>} : memref<16x32xf32, #tpu.memory_space<vmem>>, vector<16x32xf32>,
    } else {
    }
    %c0 = arith.constant 0 : index
    %c0_1 = arith.constant 0 : index
    %3 = vector.load %arg2[%c0, %c0_1] : memref<16x32xf32, #tpu.memory_space<vmem>>, vector<16x32xf32>
    %4 = arith.truncf %3 : vector<16x32xf32> to vector<16x32xbf16>
    %c0_2 = arith.constant 0 : index
    %c0_3 = arith.constant 0 : index
    %5 = vector.load %arg3[%c0_2, %c0_3] : memref<32x128xbf16, #tpu.memory_space<vmem>>, vector<32x128xbf16>
    %cst = arith.constant dense<0.000000e+00> : vector<16x128xf32>
    %6 = tpu.matmul %4, %5, %cst {dimension_numbers = #tpu.dot_dimension_numbers<[1], [0], [0], [1], [0, 0, 1, 1], [], []>} : vector<16x32xbf16>, vector<32x128xbf16>, vector<16x128xf32> -> vector<16x128xf32>
    %c0_4 = arith.constant 0 : index
    %c0_5 = arith.constant 0 : index
    %7 = vector.load %arg4[%c0_4, %c0_5] : memref<1x128xf32, #tpu.memory_space<vmem>>, vector<1x128xf32>
    %8 = vector.broadcast %7 : vector<1x128xf32> to vector<16x128xf32>
    %9 = arith.addf %6, %8 : vector<16x128xf32>
    %cst_6 = arith.constant 5.000000e-01 : f32
    %10 = vector.broadcast %cst_6 : f32 to vector<16x128xf32>
    %11 = arith.mulf %10, %9 : vector<16x128xf32>
    %cst_7 = arith.constant 4.471500e-02 : f32
    %12 = vector.broadcast %cst_7 : f32 to vector<16x128xf32>
    %13 = arith.mulf %12, %9 : vector<16x128xf32>
    %14 = arith.mulf %13, %9 : vector<16x128xf32>
    %15 = arith.mulf %14, %9 : vector<16x128xf32>
    %16 = arith.addf %9, %15 : vector<16x128xf32>
    %cst_8 = arith.constant 0.797884583 : f32
    %17 = vector.broadcast %cst_8 : f32 to vector<16x128xf32>
    %18 = arith.mulf %17, %16 : vector<16x128xf32>
    %19 = math.tanh %18 : vector<16x128xf32>
    %cst_9 = arith.constant 1.000000e+00 : f32
    %20 = vector.broadcast %cst_9 : f32 to vector<16x128xf32>
    %21 = arith.addf %20, %19 : vector<16x128xf32>
    %22 = arith.mulf %11, %21 : vector<16x128xf32>
    %c0_10 = arith.constant 0 : index
    %c0_11 = arith.constant 0 : index
    %23 = vector.load %arg8[%c0_10, %c0_11] : memref<16x32xf32, #tpu.memory_space<vmem>>, vector<16x32xf32>
    %24 = arith.truncf %22 : vector<16x128xf32> to vector<16x128xbf16>
    %c0_12 = arith.constant 0 : index
    %c0_13 = arith.constant 0 : index
    %25 = vector.load %arg5[%c0_12, %c0_13] : memref<128x32xbf16, #tpu.memory_space<vmem>>, vector<128x32xbf16>
    %cst_14 = arith.constant dense<0.000000e+00> : vector<16x32xf32>
    %26 = tpu.matmul %24, %25, %cst_14 {dimension_numbers = #tpu.dot_dimension_numbers<[1], [0], [0], [1], [0, 0, 1, 1], [], []>} : vector<16x128xbf16>, vector<128x32xbf16>, vector<16x32xf32> -> vector<16x32xf32>
    %27 = arith.addf %23, %26 : vector<16x32xf32>
    %c0_15 = arith.constant 0 : index
    %c0_16 = arith.constant 0 : index
    %28 = vector.load %arg8[%c0_15, %c0_16] : memref<16x32xf32, #tpu.memory_space<vmem>>, vector<16x32xf32>
    tpu.vector_store %arg8[%c0_15, %c0_16], %27 {strides = array<i32>} : memref<16x32xf32, #tpu.memory_space<vmem>>, vector<16x32xf32>,
    %c0_i32_17 = arith.constant 0 : i32
    %29 = arith.cmpi eq, %arg1, %c0_i32_17 : i32
    %30 = arith.extui %29 : i1 to i32
    %c0_i32_18 = arith.constant 0 : i32
    %31 = arith.cmpi ne, %30, %c0_i32_18 : i32
    scf.if %31 {
      %c0_19 = arith.constant 0 : index
      %c0_20 = arith.constant 0 : index
      %32 = vector.load %arg8[%c0_19, %c0_20] : memref<16x32xf32, #tpu.memory_space<vmem>>, vector<16x32xf32>
      %c0_21 = arith.constant 0 : index
      %c0_22 = arith.constant 0 : index
      %33 = vector.load %arg7[%c0_21, %c0_22] : memref<16x32xf32, #tpu.memory_space<vmem>>, vector<16x32xf32>
      tpu.vector_store %arg7[%c0_21, %c0_22], %32 {strides = array<i32>} : memref<16x32xf32, #tpu.memory_space<vmem>>, vector<16x32xf32>,
    } else {
    }
    return
  }
  func.func @transform_0(%arg0: i32, %arg1: i32) -> (i32, i32) {
    %c0_i32 = arith.constant 0 : i32
    %c0_i32_0 = arith.constant 0 : i32
    return %arg0, %c0_i32 : i32, i32
  }
  func.func @transform_1(%arg0: i32, %arg1: i32) -> (i32, i32) {
    %c0_i32 = arith.constant 0 : i32
    %c0_i32_0 = arith.constant 0 : i32
    return %c0_i32, %arg1 : i32, i32
  }
  func.func @transform_2(%arg0: i32, %arg1: i32) -> (i32, i32) {
    %c0_i32 = arith.constant 0 : i32
    %c0_i32_0 = arith.constant 0 : i32
    return %c0_i32, %arg1 : i32, i32
  }
  func.func @transform_3(%arg0: i32, %arg1: i32) -> (i32, i32) {
    %c0_i32 = arith.constant 0 : i32
    %c0_i32_0 = arith.constant 0 : i32
    return %arg1, %c0_i32 : i32, i32
  }
  func.func @transform_4(%arg0: i32, %arg1: i32) -> (i32, i32) {
    %c0_i32 = arith.constant 0 : i32
    %c0_i32_0 = arith.constant 0 : i32
    %c0_i32_1 = arith.constant 0 : i32
    return %c0_i32, %c0_i32_0 : i32, i32
  }
  func.func @transform_5(%arg0: i32, %arg1: i32) -> (i32, i32) {
    %c0_i32 = arith.constant 0 : i32
    %c0_i32_0 = arith.constant 0 : i32
    return %arg0, %c0_i32 : i32, i32
  }
}

</mosaic_0001>

<bundles_post_ra>
// kernel: tpu_custom_call.1
= control target key start
LH: loop header
LB: loop body
LE: loop exit
PB: predicated region body
PF: predicated region fallthrough
CT: control target
= control target key end

     0   :  { %v354_v1 = vmov 0.0   ;;  %vm355_vm0 = vmmov 0   ;;  %vm33_vm1 = vcmask 261120   ;;  %s441_s0 = inlined_call_operand.vmem [shape: f32[16,32], index: 0, kind: input, shape index: {}]   ;;  %s442_s1 = inlined_call_operand.vmem [shape: bf16[32,128], index: 1, kind: input, shape index: {}]   ;;  %s443_s2 = inlined_call_operand.vmem [shape: f32[1,128], index: 2, kind: input, shape index: {}]   ;;  %s444_s3 = inlined_call_operand.vmem [shape: bf16[128,32], index: 3, kind: input, shape index: {}]   ;;  %s445_s4 = inlined_call_operand.vmem [shape: f32[1,32], index: 4, kind: input, shape index: {}]   ;;  %s446_s5 = inlined_call_operand.hbm [shape: f32[16,32], index: 5, kind: output, shape index: {}]  }
   0x1   :  { %v318_v0 = vld [vmem:[%s442_s1 + $0x8] sm:$0xff]   ;;  %285 = vmatprep.subr.bf16.mxu0 %v354_v1  ;;  %293 = vmatprep.subr.bf16.mxu1 %v354_v1  ;;  %v319_v2 = vld [vmem:[%s442_s1] sm:$0xff]  }
   0x2   :  { %286 = vmatpush3.bf16.msra.mxu0 %v318_v0  ;;  %289 = vmatprep.mubr.msk.bf16.mxu0 %vm355_vm0, %v354_v1  ;;  %v36_v3 = vld [vmem:[%s441_s0] sm:$0xff]  ;;  %v37_v4 = vld [vmem:[%s441_s0 + $0x8] sm:$0xff] }
   0x3   :  { %287 = vmatprep.subr.bf16.mxu0 %v354_v1  ;;  %309 = vmatprep.mubr.msk.bf16.mxu1 %vm355_vm0, %v354_v1  ;;  %v38_v5 = vpack.c.bf16 %v37_v4, %v36_v3 }
   0x6   :  { %288 = vmatpush3.bf16.msra.mxu0 %v319_v2 }
   0x7   :  { %10 = vsyncpa [#allocation4], 0  ;;  %v320_v6 = vld [vmem:[%s444_s3 + $0x38] sm:$0xff]   ;;  %v321_v7 = vld [vmem:[%s444_s3 + $0x30] sm:$0xff]  }
   0x8   :  { %294 = vmatpush3.bf16.msra.mxu1 %v320_v6  ;;  %v322_v8 = vld [vmem:[%s444_s3 + $0x28] sm:$0xff]   ;;  %v323_v9 = vld [vmem:[%s444_s3 + $0x20] sm:$0xff]   ;;  %v324_v10 = vld [vmem:[%s444_s3 + $0x18] sm:$0xff]  }
   0x9   :  { %290 = vmatmul.mubr.msk.bf16.vlgmr.msra.gmra.mxu0 %vm33_vm1, %v38_v5  ;;  %295 = vmatprep.subr.bf16.mxu1 %v354_v1  ;;  %v325_v11 = vld [vmem:[%s444_s3 + $0x10] sm:$0xff]   ;;  %v326_v12 = vld [vmem:[%s444_s3 + $0x8] sm:$0xff]   ;;  %v327_v13 = vld [vmem:[%s444_s3] sm:$0xff]  }
   0xa   :  { %v260_v14 = vld [vmem:[%s445_s4] ss:$0 sm:$0xff] }
   0xb   :  { %34 = vst.msk [vmem:[#allocation2] sm:$0xff] %vm33_vm1, %v260_v14  ;;  %35 = vst.msk [vmem:[#allocation2 + $0x8] sm:$0xff] %vm33_vm1, %v260_v14  ;;  %v261_v15 = vld [vmem:[%s443_s2] ss:$0 sm:$0xff]  ;;  %s356_s2 = smov [#allocation3]  }
   0xc   :  { %296 = vmatpush3.bf16.msra.mxu1 %v321_v7  ;;  %s249_s3 = sshll.u32 %s356_s2, 4  ;;  %s250_s3 = int_to_ptr.vmem [resolvable:$true] %s249_s3 }
   0xd   :  { %297 = vmatprep.subr.bf16.mxu1 %v354_v1  ;;  %s332_s4 = scalar_lea.vmem %s250_s3, 256  ;;  %p337_p1 = scmp.lt.s32.totalorder %s250_s3, %s250_s3 }
   0xe   :  { %p333_p0 = scmp.ne.s32.totalorder %s250_s3, %s332_s4  ;;  %p338_p2 = scmp.lt.s32.totalorder %s332_s4, %s332_s4 }
  0x10   :  { %298 = vmatpush3.bf16.msra.mxu1 %v322_v8  ;;  %p339_p3 = por %p338_p2, %p337_p1 }
  0x11   :  { %299 = vmatprep.subr.bf16.mxu1 %v354_v1 }
  0x12   :  { %v125_v41 = vld [vmem:[#allocation2] sm:$0xff]  ;;  %v126_v45 = vld [vmem:[#allocation2 + $0x8] sm:$0xff]  ;;  %p340_p4 = pnand %p339_p3, %p333_p0 }
  0x14   :  { %300 = vmatpush3.bf16.msra.mxu1 %v323_v9 }
  0x15   :  { %301 = vmatprep.subr.bf16.mxu1 %v354_v1 }
  0x18   :  { %302 = vmatpush3.bf16.msra.mxu1 %v324_v10 }
  0x19   :  { %303 = vmatprep.subr.bf16.mxu1 %v354_v1 }
  0x1c   :  { %304 = vmatpush3.bf16.msra.mxu1 %v325_v11 }
  0x1d   :  { %305 = vmatprep.subr.bf16.mxu1 %v354_v1 }
  0x20   :  { %306 = vmatpush3.bf16.msra.mxu1 %v326_v12 }
  0x21   :  { %307 = vmatprep.subr.bf16.mxu1 %v354_v1 }
  0x24   :  { %308 = vmatpush3.bf16.msra.mxu1 %v327_v13 }
  0xc9   :  { %v100_v16 = vpop.f32.mrf.mxu0 }
  0xca   :  { %v101_v17 = vadd.f32 %v261_v15, %v100_v16 }
  0xcb   :  { %v291_v18 = vpop.f32.mrf.mxu0 }
  0xcc   :  { %v109_v19 = vmul.f32 0.044715, %v101_v17  ;;  %v107_v35 = vmul.f32 0.5, %v101_v17 }
  0xcd   :  { %v103_v20 = vpop.f32.mrf.mxu0 }
  0xce   :  { %v111_v21 = vmul.f32 %v109_v19, %v101_v17  ;;  %v104_v22 = vadd.f32 %v261_v15, %v103_v20 }
  0xcf   :  { %v292_v23 = vpop.f32.mrf.mxu0 }
  0xd0   :  { %v113_v24 = vmul.f32 %v111_v21, %v101_v17  ;;  %v110_v25 = vmul.f32 0.044715, %v104_v22  ;;  %v108_v36 = vmul.f32 0.5, %v104_v22 }
  0xd2   :  { %v112_v26 = vmul.f32 %v110_v25, %v104_v22  ;;  %v115_v27 = vadd.f32 %v113_v24, %v101_v17 }
  0xd4   :  { %v114_v28 = vmul.f32 %v112_v26, %v104_v22  ;;  %v117_v29 = vmul.f32 0.7978846, %v115_v27 }
  0xd6   :  { %v116_v30 = vadd.f32 %v114_v28, %v104_v22  ;;  %328 = vtanh.f32 %v117_v29 }
  0xd8   :  { %v118_v31 = vmul.f32 0.7978846, %v116_v30 }
  0xda   :  { %330 = vtanh.f32 %v118_v31 }
  0xe3   :  { %v329_v32 = vpop.eup %328 }
  0xe4   :  { %v121_v33 = vadd.f32 1.0, %v329_v32 }
  0xe6   :  { %v123_v38 = vmul.f32 %v121_v33, %v107_v35 }
  0xe7   :  { %v331_v34 = vpop.eup %330 }
  0xe8   :  { %v122_v37 = vadd.f32 1.0, %v331_v34 }
  0xea   :  { %v124_v39 = vmul.f32 %v122_v37, %v108_v36 }
  0xec   :  { %v127_v40 = vpack.c.bf16 %v124_v39, %v123_v38 }
  0xee   :  { %310 = vmatmul.mubr.bf16.vlgmr.msra.gmra.mxu1 %v127_v40 }
 0x1ae   :  { %v226_v42 = vpop.f32.mrf.mxu1 }
 0x1af   :  { %v233_v43 = vadd.f32 %v226_v42, %v125_v41 }
 0x1b0   :  { %v311_v44 = vpop.f32.mrf.mxu1 }
 0x1b1   :  { %235 = vst.msk [vmem:[#allocation2] sm:$0xff] %vm33_vm1, %v233_v43 }
 0x1b2   :  { %v229_v46 = vpop.f32.mrf.mxu1 }
 0x1b3   :  { %v234_v47 = vadd.f32 %v229_v46, %v126_v45 }
 0x1b4   :  { %v312_v48 = vpop.f32.mrf.mxu1 }
 0x1b5   :  { %236 = vst.msk [vmem:[#allocation2 + $0x8] sm:$0xff] %vm33_vm1, %v234_v47 }
 0x1b8   :  { %v240_v49 = vld [vmem:[#allocation2] sm:$0xff] }
 0x1b9   :  { %242 = vst.msk [vmem:[#allocation3] sm:$0xff] %vm33_vm1, %v240_v49 }
 0x1bc   :  { %v241_v50 = vld [vmem:[#allocation2 + $0x8] sm:$0xff] }
 0x1bd   :  { %243 = vst.msk [vmem:[#allocation3 + $0x8] sm:$0xff] %vm33_vm1, %v241_v50 }
 0x1be   :  { %343 = shalt.err (!%p340_p4)
}
 0x1bf   :  { %s357_s19 = smov 128   ;;  %s358_s20 = smov 8  }
 0x1c0   :  { %255 = dma.vmem_to_hbm [thread:$0]  %s250_s3, 256, %s446_s5, [#allocation4], %s357_s19, %s357_s19, %s358_s20  }
 0x1c1   :  { %352 = dma.done.wait [#allocation4], 256  }
 0x1c2   :  { %353 = vsyncadd [#allocation4], 4294967040 }
 0x1c3   :  { %259 = vsyncpa [#allocation4], 1 }

</bundles_post_ra>
